<compile_context>
chip_gen: v6e
topology: v6e:2x2x1
jax: 0.10.0
libtpu: 0.0.40
codegen_flags: <defaults>
</compile_context>

<pallas_src>
import math
import functools

import jax
import jax.numpy as jnp
from jax import lax
from jax.experimental import pallas as pl
from jax.experimental.pallas import tpu as pltpu


def _attn_kernel(x_ref, wqkv_ref, bqkv_ref, wp_ref, bp_ref, o_ref, *, n_head):
    x = x_ref[...].astype(jnp.bfloat16)            # (T, C) bf16 MXU operand
    T, C = x.shape
    D = C // n_head

    # Fused QKV projection: ONE bf16 MXU matmul of output width 3C, f32 accum.
    # The 1/sqrt(D) attention scale was pre-folded into the Q columns of W/b.
    qkv = jnp.dot(x, wqkv_ref[...],
                  preferred_element_type=jnp.float32) + bqkv_ref[0]   # (T, 3C) f32

    # Per-batch causal (tril) mask, hoisted out of the head loop. Finite large
    # negative value => exp underflows to exactly 0 (no -inf / NaN hazard);
    # the diagonal is always allowed so no fully-masked rows exist.
    row = lax.broadcasted_iota(jnp.int32, (T, T), 0)
    col = lax.broadcasted_iota(jnp.int32, (T, T), 1)
    causal = col <= row
    neg_big = jnp.float32(-1e30)

    heads = []
    for h in range(n_head):                        # static, unrolled (n_head small)
        qh = qkv[:, h * D:(h + 1) * D].astype(jnp.bfloat16)               # (T, D)
        kh = qkv[:, C + h * D:C + (h + 1) * D].astype(jnp.bfloat16)       # (T, D)
        vh = qkv[:, 2 * C + h * D:2 * C + (h + 1) * D].astype(jnp.bfloat16)

        att = jnp.einsum("qd,kd->qk", qh, kh,
                         preferred_element_type=jnp.float32)              # (T, T) f32
        att = jnp.where(causal, att, neg_big)
        # Softmax kept entirely in f32 (v5e has no bf16 VPU/EUP path).
        m = jnp.max(att, axis=-1, keepdims=True)
        e = jnp.exp(att - m)
        s = jnp.sum(e, axis=-1, keepdims=True)
        p = e * pl.reciprocal(s, approx=True)      # EUP reciprocal (free slot)
        # attn_dropout: identity (eval / dropout=0.0)
        heads.append(jnp.dot(p.astype(jnp.bfloat16), vh,
                             preferred_element_type=jnp.float32))         # (T, D) f32

    # Lane-concat per-head outputs (C <= 128 -> selects within one vreg lane
    # group), then ONE (T, C) @ (C, C) output projection instead of n_head
    # narrow K=D MXU pushes.
    y = jnp.concatenate(heads, axis=-1).astype(jnp.bfloat16)              # (T, C)
    out = jnp.dot(y, wp_ref[...], preferred_element_type=jnp.float32) + bp_ref[0]
    # resid_dropout: identity (eval / dropout=0.0)
    o_ref[...] = out.astype(o_ref.dtype)


def prepare_attention_params(params, n_head):
    """One-time parameter preparation, hoisted OUT of the per-call forward path.

    - fuse Q/K/V weights & biases into single (C, 3C) / (1, 3C) operands
    - fold the 1/sqrt(D) attention scale into the Q columns
    - cast matmul weights to bf16 (MXU-native); biases stay f32 (added post-acc)
    Weights are stored [in, out] (already transposed vs. nn.Linear's [out, in]).
    """
    C = params["wq"].shape[0]
    scale = 1.0 / math.sqrt(C // n_head)
    w_qkv = jnp.concatenate(
        [params["wq"] * scale, params["wk"], params["wv"]], axis=1)       # (C, 3C)
    b_qkv = jnp.concatenate(
        [params["bq"] * scale, params["bk"], params["bv"]], axis=1)       # (1, 3C)
    return {
        "w_qkv": w_qkv.astype(jnp.bfloat16),
        "b_qkv": b_qkv.astype(jnp.float32),
        "w_proj": params["wp"].astype(jnp.bfloat16),
        "b_proj": params["bp"].astype(jnp.float32),
    }


def causal_self_attention(x, fused, n_head):
    """x: (B, T, C) float32. fused: output of prepare_attention_params()."""
    B, T, C = x.shape
    D = C // n_head

    kernel = functools.partial(_attn_kernel, n_head=n_head)

    cost = pl.CostEstimate(
        flops=(2 * B * T * C * (3 * C)             # fused QKV projection
               + 4 * B * n_head * T * T * D        # QK^T + P@V
               + 2 * B * T * C * C),               # output projection
        transcendentals=B * n_head * T * T,        # exp in softmax
        bytes_accessed=(x.size * 4 + B * T * C * 4
                        + fused["w_qkv"].size * 2 + fused["b_qkv"].size * 4
                        + fused["w_proj"].size * 2 + fused["b_proj"].size * 4),
    )

    out = pl.pallas_call(
        kernel,
        out_shape=jax.ShapeDtypeStruct((B, T, C), x.dtype),
        grid_spec=pltpu.PrefetchScalarGridSpec(
            num_scalar_prefetch=0,
            grid=(B,),                                           # one step per batch elem
            in_specs=[
                pl.BlockSpec((None, T, C), lambda b: (b, 0, 0)),     # x[b]   (squeezed)
                pl.BlockSpec((C, 3 * C), lambda b: (0, 0)),          # W_qkv  (bf16)
                pl.BlockSpec((1, 3 * C), lambda b: (0, 0)),          # b_qkv  (f32)
                pl.BlockSpec((C, C), lambda b: (0, 0)),              # W_proj (bf16)
                pl.BlockSpec((1, C), lambda b: (0, 0)),              # b_proj (f32)
            ],
            out_specs=pl.BlockSpec((None, T, C), lambda b: (b, 0, 0)),
        ),
        compiler_params=pltpu.CompilerParams(
            dimension_semantics=("parallel",)),   # batch axis shards across v7x's 2 TCs
        cost_estimate=cost,
    )(x, fused["w_qkv"], fused["b_qkv"], fused["w_proj"], fused["b_proj"])

    return out


def _reference(x, params, n_head):
    """Pure-JAX f32 reference mirroring the PyTorch forward (eval, xa=None)."""
    B, T, C = x.shape
    D = C // n_head
    scale = 1.0 / math.sqrt(D)

    def proj(w, b):
        return x @ w + b[0]

    q = proj(params["wq"], params["bq"]).reshape(B, T, n_head, D).transpose(0, 2, 1, 3)
    k = proj(params["wk"], params["bk"]).reshape(B, T, n_head, D).transpose(0, 2, 1, 3)
    v = proj(params["wv"], params["bv"]).reshape(B, T, n_head, D).transpose(0, 2, 1, 3)

    att = jnp.einsum("bhqd,bhkd->bhqk", q, k) * scale
    mask = jnp.tril(jnp.ones((T, T), dtype=bool))
    att = jnp.where(mask[None, None], att, -jnp.inf)
    att = jax.nn.softmax(att, axis=-1)
    y = jnp.einsum("bhqk,bhkd->bhqd", att, v)
    y = y.transpose(0, 2, 1, 3).reshape(B, T, C)
    return y @ params["wp"] + params["bp"][0]


if __name__ == "__main__":
    # config: n_embd=32, n_head=4, bias=True, dropout=0.0
    B, T, C, H = 2, 8, 32, 4

    key = jax.random.PRNGKey(0)
    keys = jax.random.split(key, 9)
    init = lambda k, shape, s: (jax.random.normal(k, shape, jnp.float32) * s)

    params = {
        # stored as [in, out] (already transposed vs. nn.Linear's [out, in])
        "wq": init(keys[0], (C, C), 0.02),
        "wk": init(keys[1], (C, C), 0.02),
        "wv": init(keys[2], (C, C), 0.02),
        "wp": init(keys[3], (C, C), 0.02),
        "bq": init(keys[4], (1, C), 0.01),
        "bk": init(keys[5], (1, C), 0.01),
        "bv": init(keys[6], (1, C), 0.01),
        "bp": init(keys[7], (1, C), 0.01),
    }
    x = jax.random.normal(keys[8], (B, T, C), jnp.float32)

    # One-time parameter fusion / scale-fold / bf16 cast (NOT on the call path).
    fused = prepare_attention_params(params, H)

    y = causal_self_attention(x, fused, H)
    y = jax.block_until_ready(y)

    y_ref = _reference(x, params, H)
    # Tolerance accounts for bf16 MXU operands (f32 accumulation) and the
    # approximate EUP reciprocal in the softmax normalization; reference is
    # full-f32 like the PyTorch module.
    max_err = float(jnp.max(jnp.abs(y - y_ref)))
    assert jnp.allclose(y, y_ref, atol=5e-3, rtol=5e-2), (
        f"mismatch vs reference (max abs err={max_err})")

    print("KERNEL_OK")
</pallas_src>

<mosaic_0001>
module attributes {stable_mosaic.version = 11 : i64} {
  func.func @_attn_kernel(%arg0: i32, %arg1: memref<1x8x32xf32, #tpu.memory_space<vmem>>, %arg2: memref<32x96xbf16, #tpu.memory_space<vmem>>, %arg3: memref<1x96xf32, #tpu.memory_space<vmem>>, %arg4: memref<32x32xbf16, #tpu.memory_space<vmem>>, %arg5: memref<1x32xf32, #tpu.memory_space<vmem>>, %arg6: memref<1x8x32xf32, #tpu.memory_space<vmem>>) attributes {dimension_semantics = [#tpu.dimension_semantics<parallel>], iteration_bounds = array<i64: 2>, scalar_prefetch = 0 : i64, scratch_operands = 0 : i64, tpu.core_type = #tpu.core_type<tc>, window_params = [{transform_indices = @transform_0, window_bounds = array<i64: 1, 8, 32>}, {pipeline_mode = #tpu.pipeline_mode<synchronous>, transform_indices = @transform_1, window_bounds = array<i64: 32, 96>}, {pipeline_mode = #tpu.pipeline_mode<synchronous>, transform_indices = @transform_2, window_bounds = array<i64: 1, 96>}, {pipeline_mode = #tpu.pipeline_mode<synchronous>, transform_indices = @transform_3, window_bounds = array<i64: 32, 32>}, {pipeline_mode = #tpu.pipeline_mode<synchronous>, transform_indices = @transform_4, window_bounds = array<i64: 1, 32>}, {transform_indices = @transform_5, window_bounds = array<i64: 1, 8, 32>}]} {
    %c0 = arith.constant 0 : index
    %c0_0 = arith.constant 0 : index
    %c0_1 = arith.constant 0 : index
    %0 = vector.load %arg1[%c0, %c0_0, %c0_1] : memref<1x8x32xf32, #tpu.memory_space<vmem>>, vector<1x8x32xf32>
    %1 = vector.shape_cast %0 : vector<1x8x32xf32> to vector<8x32xf32>
    %2 = arith.truncf %1 : vector<8x32xf32> to vector<8x32xbf16>
    %c0_2 = arith.constant 0 : index
    %c0_3 = arith.constant 0 : index
    %3 = vector.load %arg2[%c0_2, %c0_3] : memref<32x96xbf16, #tpu.memory_space<vmem>>, vector<32x96xbf16>
    %cst = arith.constant dense<0.000000e+00> : vector<8x96xf32>
    %4 = tpu.matmul %2, %3, %cst {dimension_numbers = #tpu.dot_dimension_numbers<[1], [0], [0], [1], [0, 0, 1, 1], [], []>} : vector<8x32xbf16>, vector<32x96xbf16>, vector<8x96xf32> -> vector<8x96xf32>
    %c0_4 = arith.constant 0 : index
    %c0_5 = arith.constant 0 : index
    %5 = vector.load %arg3[%c0_4, %c0_5] : memref<1x96xf32, #tpu.memory_space<vmem>>, vector<1x96xf32>
    %6 = vector.shape_cast %5 : vector<1x96xf32> to vector<96xf32>
    %7 = vector.shape_cast %6 : vector<96xf32> to vector<1x96xf32>
    %8 = vector.broadcast %7 : vector<1x96xf32> to vector<8x96xf32>
    %9 = arith.addf %4, %8 : vector<8x96xf32>
    %10 = tpu.iota {dimensions = array<i32: 0>} : vector<8x8xi32>
    %11 = tpu.iota {dimensions = array<i32: 1>} : vector<8x8xi32>
    %12 = arith.cmpi sle, %11, %10 : vector<8x8xi32>
    %13 = vector.extract_strided_slice %9 {offsets = [0, 0], sizes = [8, 8], strides = [1, 1]} : vector<8x96xf32> to vector<8x8xf32>
    %14 = arith.truncf %13 : vector<8x8xf32> to vector<8x8xbf16>
    %15 = vector.extract_strided_slice %9 {offsets = [0, 32], sizes = [8, 8], strides = [1, 1]} : vector<8x96xf32> to vector<8x8xf32>
    %16 = arith.truncf %15 : vector<8x8xf32> to vector<8x8xbf16>
    %17 = vector.extract_strided_slice %9 {offsets = [0, 64], sizes = [8, 8], strides = [1, 1]} : vector<8x96xf32> to vector<8x8xf32>
    %18 = arith.truncf %17 : vector<8x8xf32> to vector<8x8xbf16>
    "tpu.trace_start"() <{level = 10 : i32, message = "qd,kd->qk"}> : () -> ()
    %cst_6 = arith.constant dense<0.000000e+00> : vector<8x8xf32>
    %19 = tpu.matmul %14, %16, %cst_6 {dimension_numbers = #tpu.dot_dimension_numbers<[1], [1], [0], [0], [0, 0, 1, 0], [], []>} : vector<8x8xbf16>, vector<8x8xbf16>, vector<8x8xf32> -> vector<8x8xf32>
    %cst_7 = arith.constant -1.000000e+30 : f32
    "tpu.trace_stop"() : () -> ()
    %20 = vector.broadcast %cst_7 : f32 to vector<8x8xf32>
    %21 = arith.select %12, %19, %20 : vector<8x8xi1>, vector<8x8xf32>
    %cst_8 = arith.constant dense<0xFF800000> : vector<8xf32>
    %22 = vector.multi_reduction <maximumf>, %21, %cst_8 [1] : vector<8x8xf32> to vector<8xf32>
    %23 = vector.shape_cast %22 : vector<8xf32> to vector<8x1xf32>
    %24 = vector.broadcast %23 : vector<8x1xf32> to vector<8x8xf32>
    %25 = arith.subf %21, %24 : vector<8x8xf32>
    %26 = math.exp %25 : vector<8x8xf32>
    %cst_9 = arith.constant dense<0.000000e+00> : vector<8xf32>
    %27 = vector.multi_reduction <add>, %26, %cst_9 [1] : vector<8x8xf32> to vector<8xf32>
    %28 = vector.shape_cast %27 : vector<8xf32> to vector<8x1xf32>
    %29 = tpu.reciprocal %28 {approx = true} : vector<8x1xf32> -> vector<8x1xf32>
    %30 = vector.broadcast %29 : vector<8x1xf32> to vector<8x8xf32>
    %31 = arith.mulf %26, %30 : vector<8x8xf32>
    %32 = arith.truncf %31 : vector<8x8xf32> to vector<8x8xbf16>
    %cst_10 = arith.constant dense<0.000000e+00> : vector<8x8xf32>
    %33 = tpu.matmul %32, %18, %cst_10 {dimension_numbers = #tpu.dot_dimension_numbers<[1], [0], [0], [1], [0, 0, 1, 1], [], []>} : vector<8x8xbf16>, vector<8x8xbf16>, vector<8x8xf32> -> vector<8x8xf32>
    %34 = vector.extract_strided_slice %9 {offsets = [0, 8], sizes = [8, 8], strides = [1, 1]} : vector<8x96xf32> to vector<8x8xf32>
    %35 = arith.truncf %34 : vector<8x8xf32> to vector<8x8xbf16>
    %36 = vector.extract_strided_slice %9 {offsets = [0, 40], sizes = [8, 8], strides = [1, 1]} : vector<8x96xf32> to vector<8x8xf32>
    %37 = arith.truncf %36 : vector<8x8xf32> to vector<8x8xbf16>
    %38 = vector.extract_strided_slice %9 {offsets = [0, 72], sizes = [8, 8], strides = [1, 1]} : vector<8x96xf32> to vector<8x8xf32>
    %39 = arith.truncf %38 : vector<8x8xf32> to vector<8x8xbf16>
    "tpu.trace_start"() <{level = 10 : i32, message = "qd,kd->qk"}> : () -> ()
    %cst_11 = arith.constant dense<0.000000e+00> : vector<8x8xf32>
    %40 = tpu.matmul %35, %37, %cst_11 {dimension_numbers = #tpu.dot_dimension_numbers<[1], [1], [0], [0], [0, 0, 1, 0], [], []>} : vector<8x8xbf16>, vector<8x8xbf16>, vector<8x8xf32> -> vector<8x8xf32>
    %cst_12 = arith.constant -1.000000e+30 : f32
    "tpu.trace_stop"() : () -> ()
    %41 = vector.broadcast %cst_12 : f32 to vector<8x8xf32>
    %42 = arith.select %12, %40, %41 : vector<8x8xi1>, vector<8x8xf32>
    %cst_13 = arith.constant dense<0xFF800000> : vector<8xf32>
    %43 = vector.multi_reduction <maximumf>, %42, %cst_13 [1] : vector<8x8xf32> to vector<8xf32>
    %44 = vector.shape_cast %43 : vector<8xf32> to vector<8x1xf32>
    %45 = vector.broadcast %44 : vector<8x1xf32> to vector<8x8xf32>
    %46 = arith.subf %42, %45 : vector<8x8xf32>
    %47 = math.exp %46 : vector<8x8xf32>
    %cst_14 = arith.constant dense<0.000000e+00> : vector<8xf32>
    %48 = vector.multi_reduction <add>, %47, %cst_14 [1] : vector<8x8xf32> to vector<8xf32>
    %49 = vector.shape_cast %48 : vector<8xf32> to vector<8x1xf32>
    %50 = tpu.reciprocal %49 {approx = true} : vector<8x1xf32> -> vector<8x1xf32>
    %51 = vector.broadcast %50 : vector<8x1xf32> to vector<8x8xf32>
    %52 = arith.mulf %47, %51 : vector<8x8xf32>
    %53 = arith.truncf %52 : vector<8x8xf32> to vector<8x8xbf16>
    %cst_15 = arith.constant dense<0.000000e+00> : vector<8x8xf32>
    %54 = tpu.matmul %53, %39, %cst_15 {dimension_numbers = #tpu.dot_dimension_numbers<[1], [0], [0], [1], [0, 0, 1, 1], [], []>} : vector<8x8xbf16>, vector<8x8xbf16>, vector<8x8xf32> -> vector<8x8xf32>
    %55 = vector.extract_strided_slice %9 {offsets = [0, 16], sizes = [8, 8], strides = [1, 1]} : vector<8x96xf32> to vector<8x8xf32>
    %56 = arith.truncf %55 : vector<8x8xf32> to vector<8x8xbf16>
    %57 = vector.extract_strided_slice %9 {offsets = [0, 48], sizes = [8, 8], strides = [1, 1]} : vector<8x96xf32> to vector<8x8xf32>
    %58 = arith.truncf %57 : vector<8x8xf32> to vector<8x8xbf16>
    %59 = vector.extract_strided_slice %9 {offsets = [0, 80], sizes = [8, 8], strides = [1, 1]} : vector<8x96xf32> to vector<8x8xf32>
    %60 = arith.truncf %59 : vector<8x8xf32> to vector<8x8xbf16>
    "tpu.trace_start"() <{level = 10 : i32, message = "qd,kd->qk"}> : () -> ()
    %cst_16 = arith.constant dense<0.000000e+00> : vector<8x8xf32>
    %61 = tpu.matmul %56, %58, %cst_16 {dimension_numbers = #tpu.dot_dimension_numbers<[1], [1], [0], [0], [0, 0, 1, 0], [], []>} : vector<8x8xbf16>, vector<8x8xbf16>, vector<8x8xf32> -> vector<8x8xf32>
    %cst_17 = arith.constant -1.000000e+30 : f32
    "tpu.trace_stop"() : () -> ()
    %62 = vector.broadcast %cst_17 : f32 to vector<8x8xf32>
    %63 = arith.select %12, %61, %62 : vector<8x8xi1>, vector<8x8xf32>
    %cst_18 = arith.constant dense<0xFF800000> : vector<8xf32>
    %64 = vector.multi_reduction <maximumf>, %63, %cst_18 [1] : vector<8x8xf32> to vector<8xf32>
    %65 = vector.shape_cast %64 : vector<8xf32> to vector<8x1xf32>
    %66 = vector.broadcast %65 : vector<8x1xf32> to vector<8x8xf32>
    %67 = arith.subf %63, %66 : vector<8x8xf32>
    %68 = math.exp %67 : vector<8x8xf32>
    %cst_19 = arith.constant dense<0.000000e+00> : vector<8xf32>
    %69 = vector.multi_reduction <add>, %68, %cst_19 [1] : vector<8x8xf32> to vector<8xf32>
    %70 = vector.shape_cast %69 : vector<8xf32> to vector<8x1xf32>
    %71 = tpu.reciprocal %70 {approx = true} : vector<8x1xf32> -> vector<8x1xf32>
    %72 = vector.broadcast %71 : vector<8x1xf32> to vector<8x8xf32>
    %73 = arith.mulf %68, %72 : vector<8x8xf32>
    %74 = arith.truncf %73 : vector<8x8xf32> to vector<8x8xbf16>
    %cst_20 = arith.constant dense<0.000000e+00> : vector<8x8xf32>
    %75 = tpu.matmul %74, %60, %cst_20 {dimension_numbers = #tpu.dot_dimension_numbers<[1], [0], [0], [1], [0, 0, 1, 1], [], []>} : vector<8x8xbf16>, vector<8x8xbf16>, vector<8x8xf32> -> vector<8x8xf32>
    %76 = vector.extract_strided_slice %9 {offsets = [0, 24], sizes = [8, 8], strides = [1, 1]} : vector<8x96xf32> to vector<8x8xf32>
    %77 = arith.truncf %76 : vector<8x8xf32> to vector<8x8xbf16>
    %78 = vector.extract_strided_slice %9 {offsets = [0, 56], sizes = [8, 8], strides = [1, 1]} : vector<8x96xf32> to vector<8x8xf32>
    %79 = arith.truncf %78 : vector<8x8xf32> to vector<8x8xbf16>
    %80 = vector.extract_strided_slice %9 {offsets = [0, 88], sizes = [8, 8], strides = [1, 1]} : vector<8x96xf32> to vector<8x8xf32>
    %81 = arith.truncf %80 : vector<8x8xf32> to vector<8x8xbf16>
    "tpu.trace_start"() <{level = 10 : i32, message = "qd,kd->qk"}> : () -> ()
    %cst_21 = arith.constant dense<0.000000e+00> : vector<8x8xf32>
    %82 = tpu.matmul %77, %79, %cst_21 {dimension_numbers = #tpu.dot_dimension_numbers<[1], [1], [0], [0], [0, 0, 1, 0], [], []>} : vector<8x8xbf16>, vector<8x8xbf16>, vector<8x8xf32> -> vector<8x8xf32>
    %cst_22 = arith.constant -1.000000e+30 : f32
    "tpu.trace_stop"() : () -> ()
    %83 = vector.broadcast %cst_22 : f32 to vector<8x8xf32>
    %84 = arith.select %12, %82, %83 : vector<8x8xi1>, vector<8x8xf32>
    %cst_23 = arith.constant dense<0xFF800000> : vector<8xf32>
    %85 = vector.multi_reduction <maximumf>, %84, %cst_23 [1] : vector<8x8xf32> to vector<8xf32>
    %86 = vector.shape_cast %85 : vector<8xf32> to vector<8x1xf32>
    %87 = vector.broadcast %86 : vector<8x1xf32> to vector<8x8xf32>
    %88 = arith.subf %84, %87 : vector<8x8xf32>
    %89 = math.exp %88 : vector<8x8xf32>
    %cst_24 = arith.constant dense<0.000000e+00> : vector<8xf32>
    %90 = vector.multi_reduction <add>, %89, %cst_24 [1] : vector<8x8xf32> to vector<8xf32>
    %91 = vector.shape_cast %90 : vector<8xf32> to vector<8x1xf32>
    %92 = tpu.reciprocal %91 {approx = true} : vector<8x1xf32> -> vector<8x1xf32>
    %93 = vector.broadcast %92 : vector<8x1xf32> to vector<8x8xf32>
    %94 = arith.mulf %89, %93 : vector<8x8xf32>
    %95 = arith.truncf %94 : vector<8x8xf32> to vector<8x8xbf16>
    %cst_25 = arith.constant dense<0.000000e+00> : vector<8x8xf32>
    %96 = tpu.matmul %95, %81, %cst_25 {dimension_numbers = #tpu.dot_dimension_numbers<[1], [0], [0], [1], [0, 0, 1, 1], [], []>} : vector<8x8xbf16>, vector<8x8xbf16>, vector<8x8xf32> -> vector<8x8xf32>
    %97 = tpu.concatenate %33, %54, %75, %96 in 1 : vector<8x8xf32>, vector<8x8xf32>, vector<8x8xf32>, vector<8x8xf32> -> vector<8x32xf32>
    %98 = arith.truncf %97 : vector<8x32xf32> to vector<8x32xbf16>
    %c0_26 = arith.constant 0 : index
    %c0_27 = arith.constant 0 : index
    %99 = vector.load %arg4[%c0_26, %c0_27] : memref<32x32xbf16, #tpu.memory_space<vmem>>, vector<32x32xbf16>
    %cst_28 = arith.constant dense<0.000000e+00> : vector<8x32xf32>
    %100 = tpu.matmul %98, %99, %cst_28 {dimension_numbers = #tpu.dot_dimension_numbers<[1], [0], [0], [1], [0, 0, 1, 1], [], []>} : vector<8x32xbf16>, vector<32x32xbf16>, vector<8x32xf32> -> vector<8x32xf32>
    %c0_29 = arith.constant 0 : index
    %c0_30 = arith.constant 0 : index
    %101 = vector.load %arg5[%c0_29, %c0_30] : memref<1x32xf32, #tpu.memory_space<vmem>>, vector<1x32xf32>
    %102 = vector.shape_cast %101 : vector<1x32xf32> to vector<32xf32>
    %103 = vector.shape_cast %102 : vector<32xf32> to vector<1x32xf32>
    %104 = vector.broadcast %103 : vector<1x32xf32> to vector<8x32xf32>
    %105 = arith.addf %100, %104 : vector<8x32xf32>
    %c0_31 = arith.constant 0 : index
    %c0_32 = arith.constant 0 : index
    %c0_33 = arith.constant 0 : index
    %106 = vector.load %arg6[%c0_31, %c0_32, %c0_33] : memref<1x8x32xf32, #tpu.memory_space<vmem>>, vector<1x8x32xf32>
    %107 = vector.shape_cast %106 : vector<1x8x32xf32> to vector<8x32xf32>
    %108 = vector.shape_cast %105 : vector<8x32xf32> to vector<1x8x32xf32>
    tpu.vector_store %arg6[%c0_31, %c0_32, %c0_33], %108 {strides = array<i32>} : memref<1x8x32xf32, #tpu.memory_space<vmem>>, vector<1x8x32xf32>,
    return
  }
  func.func @transform_0(%arg0: i32) -> (i32, i32, i32) {
    %c0_i32 = arith.constant 0 : i32
    %c0_i32_0 = arith.constant 0 : i32
    %c0_i32_1 = arith.constant 0 : i32
    return %arg0, %c0_i32, %c0_i32_0 : i32, i32, i32
  }
  func.func @transform_1(%arg0: i32) -> (i32, i32) {
    %c0_i32 = arith.constant 0 : i32
    %c0_i32_0 = arith.constant 0 : i32
    %c0_i32_1 = arith.constant 0 : i32
    return %c0_i32, %c0_i32_0 : i32, i32
  }
  func.func @transform_2(%arg0: i32) -> (i32, i32) {
    %c0_i32 = arith.constant 0 : i32
    %c0_i32_0 = arith.constant 0 : i32
    %c0_i32_1 = arith.constant 0 : i32
    return %c0_i32, %c0_i32_0 : i32, i32
  }
  func.func @transform_3(%arg0: i32) -> (i32, i32) {
    %c0_i32 = arith.constant 0 : i32
    %c0_i32_0 = arith.constant 0 : i32
    %c0_i32_1 = arith.constant 0 : i32
    return %c0_i32, %c0_i32_0 : i32, i32
  }
  func.func @transform_4(%arg0: i32) -> (i32, i32) {
    %c0_i32 = arith.constant 0 : i32
    %c0_i32_0 = arith.constant 0 : i32
    %c0_i32_1 = arith.constant 0 : i32
    return %c0_i32, %c0_i32_0 : i32, i32
  }
  func.func @transform_5(%arg0: i32) -> (i32, i32, i32) {
    %c0_i32 = arith.constant 0 : i32
    %c0_i32_0 = arith.constant 0 : i32
    %c0_i32_1 = arith.constant 0 : i32
    return %arg0, %c0_i32, %c0_i32_0 : i32, i32, i32
  }
}

</mosaic_0001>

<bundles_post_ra>
// kernel: tpu_custom_call.1
= control target key start
LH: loop header
LB: loop body
LE: loop exit
PB: predicated region body
PF: predicated region fallthrough
CT: control target
= control target key end

     0   :  { %10 = vsyncpa [#allocation3], 0  ;;  %s1668_s0 = inlined_call_operand.hbm [shape: f32[2,8,32], index: 0, kind: input, shape index: {}]   ;;  %s1669_s1 = inlined_call_operand.hbm [shape: bf16[32,96], index: 1, kind: input, shape index: {}]   ;;  %s1670_s2 = inlined_call_operand.vmem [shape: f32[1,96], index: 2, kind: input, shape index: {}]   ;;  %s1671_s3 = inlined_call_operand.hbm [shape: bf16[32,32], index: 3, kind: input, shape index: {}]   ;;  %s1672_s4 = inlined_call_operand.vmem [shape: f32[1,32], index: 4, kind: input, shape index: {}]   ;;  %s1673_s5 = inlined_call_operand.hbm [shape: f32[2,8,32], index: 5, kind: output, shape index: {}]  }
   0x1   :  { %12 = vsyncpa [#allocation3 + $0x1], 0 }
   0x2   :  { %13 = vsyncpa [#allocation6], 0 }
   0x3   :  { %14 = vsyncpa [#allocation4], 0 }
   0x4   :  { %16 = vsyncpa [#allocation4 + $0x1], 0  ;;  %s1403_s18 = smov 0   ;;  %s1405_s19 = smov 0  }
   0x5   :  { %s1407_s20 = smov 0   ;;  %s1409_s21 = smov 0  }
   0x6 LB: > { %s1424_s22 = sadd.s32 4294967295, %s1349_s21   ;;  %s978_s23 = sadd.s32 4294967294, %s1349_s21   ;;  %s1349_s21 = sphi %s1409_s21, %s1695_s21   ;;  %s1345_s20 = sphi %s1407_s20, %s1694_s20   ;;  %s1341_s19 = sphi %s1405_s19, %s1693_s19   ;;  %s1337_s18 = sphi %s1403_s18, %s1692_s18  }
   0x7   : > { %p42_p0 = scmp.ne.s32.totalorder %s1341_s19, %s1337_s18  ;;  %p1674_p1 = scmp.eq.s32.totalorder %s1424_s22, 0 }
   0x8   : > { %p156_p3 = scmp.eq.s32.totalorder %s978_s23, 1  ;;  %p979_p5 = scmp.ge.s32.totalorder %s1349_s21, 1 }
   0x9   : > { %p1433_p4 = por %p1674_p1, %p42_p0  ;;  %p163_p7 = scmp.lt.s32.totalorder %s1349_s21, 3 }
   0xa   : > { %p1438_p6 = por %p156_p3, %p42_p0  ;;  %s1351_s27 = smov [#allocation5]  }
   0xb   : > { %s1678_s24 = scalar_select %p1433_p4, 1, 0 }
   0xc   : > { %s1679_s25 = scalar_select %p1438_p6, 1, 0 }
   0xd   : > { %p1443_p8 = pnand %p979_p5, %p163_p7  ;;  %s175_s28 = sshll.u32 %s1351_s27, 4  ;;  %s176_s28 = int_to_ptr.vmem [resolvable:$true] %s175_s28 }
   0xe   : > { %s1352_s30 = smov [#allocation7]   ;;  %s1212_s7 = scalar_lea.vmem %s176_s28, 256 }
   0xf   : > { %s1680_s26 = scalar_select %p1443_p8, 1, 0 }
  0x10   : > { %p1108_p9 = pneg %p1443_p8  ;;  %s191_s6 = sshll.u32 %s1352_s30, 4  ;;  %s192_s6 = int_to_ptr.vmem [resolvable:$true] %s191_s6 }
  0x11   : > { %p1213_p13 = scmp.ne.s32.totalorder %s176_s28, %s1212_s7  ;;  %p1220_p5 = scmp.lt.s32.totalorder %s176_s28, %s176_s28 }
  0x12   : > { %p1452_p11 = pnand %p1108_p9, %p1674_p1  ;;  %p1221_p7 = scmp.lt.s32.totalorder %s1212_s7, %s1212_s7 }
  0x14   : > { %p1203_p12 = pneg %p1452_p11  ;;  %p1222_p10 = por %p1221_p7, %p1220_p5 }
  0x16   : > { %p1215_p0 = pnand %p1213_p13, %p1203_p12 }
  0x18   : > { %p1216_p3 = pneg %p1215_p0 }
  0x1a   : > { %p1223_p9 = pnand %p1222_p10, %p1216_p3 }
  0x1c   : > { %1226 = shalt.err (!%p1223_p9)
}
  0x1d   : > { %s1353_s8 = smov 64   ;;  %s1354_s9 = smov 4  }
  0x1e   : > { %1111 = dma.hbm_to_vmem [thread:$0]  (!%p1452_p11), %s1669_s1, 256, %s176_s28, [#allocation6], %s1353_s8, %s1353_s8, %s1354_s9  }
  0x1f   : > { %s1238_s12 = scalar_lea.vmem %s192_s6, 256  ;;  %p1246_p2 = scmp.lt.s32.totalorder %s192_s6, %s192_s6 }
  0x20   : > { %p1239_p1 = scmp.ne.s32.totalorder %s192_s6, %s1238_s12  ;;  %p1247_p6 = scmp.lt.s32.totalorder %s1238_s12, %s1238_s12 }
  0x22   : > { %p1241_p13 = pnand %p1239_p1, %p1203_p12  ;;  %p1248_p5 = por %p1247_p6, %p1246_p2 }
  0x24   : > { %p1242_p0 = pneg %p1241_p13 }
  0x26   : > { %p1249_p10 = pnand %p1248_p5, %p1242_p0 }
  0x28   : > { %1252 = shalt.err (!%p1249_p10)
}
  0x29   : > { %1114 = dma.hbm_to_vmem [thread:$0]  (!%p1452_p11), %s1671_s3, 256, %s192_s6, [#allocation6], %s1353_s8, %s1353_s8, %s1354_s9  }
  0x2a   : > { %s1475_s15 = sadd.s32 1, %s1349_s21   ;;  %s29_s16 = sadd.s32 1, %s1345_s20 }
  0x2b   : > { %s26_s17 = ssub.s32 %s1349_s21, %s1475_s15  ;;  %p36_p1 = scmp.ne.s32.totalorder %s1345_s20, %s1341_s19 }
  0x2c   : > { %p27_p2 = scmp.eq.s32.totalorder %s26_s17, 0  ;;  %p37_p6 = scmp.eq.s32.totalorder %s1349_s21, 0 }
  0x2d   : > { %p1682_p12 = scmp.eq.s32.totalorder %s1424_s22, 1  ;;  %p1125_p7 = scmp.lt.s32.totalorder %s1349_s21, 2 }
  0x2e   : > { %s1491_s27 = scalar_select %p27_p2, %s1345_s20, %s29_s16  }
  0x2f   : > { %p1485_p3 = por %p1682_p12, %p36_p1  ;;  %p38_p9 = por %p37_p6, %p36_p1 }
  0x30   : > { %s208_s28 = sand.u32 1, %s1345_s20   ;;  %s984_s30 = sshll.u32 %s1349_s21, 7 }
  0x31   : > { %s1683_s23 = scalar_select %p1485_p3, 1, 0 }
  0x32   : > { %s983_s29 = sshll.u32 %s208_s28, 3  ;;  %s1498_s8 = scalar_lea.hbm %s1668_s0, %s984_s30 }
  0x33   : > { %s212_s9 = scalar_lea.vmem [#allocation2], %s983_s29  ;;  %p1500_p11 = pnand %p1125_p7, %p38_p9 }
  0x34   : > { %s219_s10 = sshll.u32 %s212_s9, 4  ;;  %s209_s12 = scalar_lea.sflag [#allocation3], %s208_s28  ;;  %s220_s10 = int_to_ptr.vmem [resolvable:$true] %s219_s10 }
  0x35   : > { %s1253_s13 = scalar_lea.hbm %s1498_s8, 128  ;;  %p1255_p0 = pneg %p1500_p11 }
  0x36   : > { %p1254_p13 = scmp.ne.s32.totalorder %s1498_s8, %s1253_s13  ;;  %s1258_s17 = scalar_lea.hbm %s1668_s0, 256 }
  0x37   : > { %p1259_p1 = scmp.lt.s32.totalorder %s1498_s8, %s1668_s0  ;;  %p1260_p2 = scmp.lt.s32.totalorder %s1258_s17, %s1253_s13 }
  0x38   : > { %p1256_p5 = pnand %p1255_p0, %p1254_p13 }
  0x39   : > { %p1261_p6 = por %p1260_p2, %p1259_p1 }
  0x3a   : > { %p1257_p10 = pneg %p1256_p5 }
  0x3c   : > { %p1262_p12 = pnand %p1261_p6, %p1257_p10 }
  0x3e   : > { %1265 = shalt.err (!%p1262_p12)
}
  0x3f   : > { %s1266_s6 = scalar_lea.vmem %s220_s10, 128  ;;  %s1355_s28 = smov [#allocation2]  }
  0x40   : > { %p1267_p7 = scmp.ne.s32.totalorder %s220_s10, %s1266_s6  ;;  %s1271_s7 = sshll.u32 %s1355_s28, 4  ;;  %s1272_s7 = int_to_ptr.vmem [resolvable:$false] %s1271_s7 }
  0x41   : > { %s1273_s9 = scalar_lea.vmem %s1272_s7, 256  ;;  %p1274_p13 = scmp.lt.s32.totalorder %s220_s10, %s1272_s7 }
  0x42   : > { %p1269_p9 = pnand %p1267_p7, %p1255_p0  ;;  %p1275_p5 = scmp.lt.s32.totalorder %s1273_s9, %s1266_s6 }
  0x44   : > { %p1270_p3 = pneg %p1269_p9  ;;  %p1276_p4 = por %p1275_p5, %p1274_p13 }
  0x46   : > { %p1277_p8 = pnand %p1276_p4, %p1270_p3 }
  0x48   : > { %1280 = shalt.err (!%p1277_p8)
}
  0x49   : > { %1118 = dma.hbm_to_vmem [thread:$0]  (!%p1500_p11), %s1498_s8, 128, %s220_s10, %s209_s12  }
  0x4a   : > { %p1685_p10 = scmp.ne.s32.totalorder %s1680_s26, 0 }
  0x4b   : > { %s1521_s13 = sand.u32 (!%p1685_p10), 1, %s1341_s19   ;;  %p1686_p4 = scmp.ne.s32.totalorder (!%p1685_p10), %s1678_s24, 0 }
  0x4c   : > { %228 = sbr.rel (%p1685_p10) target bundleno = 1504 (0x5e0), region = 40  ;;  %s986_s14 = sshll.u32 (!%p1685_p10), %s1521_s13, 3 }
  0x4d   : > { %s231_s16 = scalar_lea.sflag (!%p1685_p10), [#allocation3], %s1521_s13  ;;  %s234_s17 = scalar_lea.vmem (!%p1685_p10), [#allocation2], %s986_s14 }
  0x51   : > { %1324 = dma.done.wait (%p1686_p4), %s231_s16, 128  }
  0x52   : > { %1326 = vsyncadd (%p1686_p4), %s231_s16, 4294967168  ;;  %p1687_p8 = scmp.eq.s32.totalorder %s1424_s22, 0 }
  0x54   : > { %1328 = dma.done.wait (%p1687_p8), [#allocation6], 512   ;;  %p1688_p3 = pmov %p1687_p8 }
  0x55   : > { %v1356_v0 = vmov 0.0   ;;  %vm1357_vm0 = vmmov 0   ;;  %v1181_v1 = vld [vmem:[#allocation5 + $0x8] sm:$0xff]   ;;  %v1182_v2 = vld [vmem:[#allocation5] sm:$0xff]   ;;  %v270_v3 = vld [vmem:[%s234_s17] sm:$0xff]  ;;  %vm295_vm1 = vcmask 261120   ;;  %v339_v23 = vlaneseq }
  0x56   : > { %1330 = vsyncadd (%p1688_p3), [#allocation6], 4294966784  ;;  %1032 = vmatprep.subr.bf16.mxu0 %v1356_v0  ;;  %1036 = vmatprep.mubr.msk.bf16.mxu0 %vm1357_vm0, %v1356_v0  ;;  %v271_v4 = vpack.c.bf16 %v270_v3, %v270_v3  ;;  %v990_v5 = vld [vmem:[%s1670_s2] ss:$0 sm:$0xff]  ;;  %s1358_s8 = smov 120   ;;  %s1359_s10 = smov 96  }
  0x57   : > { %1040 = vmatprep.subr.bf16.mxu1 %v1356_v0  ;;  %1042 = vmatprep.mubr.msk.bf16.mxu1 %vm1357_vm0, %v1356_v0  ;;  %s1360_s11 = smov 80   ;;  %s1361_s12 = smov 88   ;;  %vm348_vm2 = vcmask 64512   ;;  %v340_v24 = vshrl.u32 %v339_v23, 7  ;;  %v342_v25 = vand.u32 127, %v339_v23  ;;  %vm413_vm4 = vcmask 1043456  }
  0x58   : > { %1033 = vmatpush3.bf16.msra.mxu0 %v1181_v1  ;;  %s1362_s30 = smov 72   ;;  %s1363_s29 = smov 112   ;;  %vm803_vm5 = vcmask 130048   ;;  %vm805_vm6 = vcmask 195584  }
  0x59   : > { %1034 = vmatprep.subr.bf16.mxu0 %v1356_v0  ;;  %s1364_s6 = smov 104   ;;  %vm343_vm3 = vcmp.le.s32.totalorder %v342_v25, %v340_v24  ;;  %s1365_s28 = smov 56  }
  0x5a   : > { %s1366_s7 = smov 64   ;;  %s1367_s9 = smov 40  }
  0x5b   : > { %s1368_s16 = smov 48   ;;  %s1369_s17 = smov 8  }
  0x5c   : > { %1035 = vmatpush3.bf16.msra.mxu0 %v1182_v2  ;;  %s1370_s24 = smov 16   ;;  %s1371_s26 = smov 24  }
  0x5d   : > { %1046 = vmatprep.subr.bf16.mxu0 %v1356_v0  ;;  %p1689_p0 = scmp.ne.s32.totalorder %s1683_s23, 0 }
  0x5f   : > { %1037 = vmatmul.mubr.msk.bf16.vlgmr.msra.gmra.mxu0 %vm295_vm1, %v271_v4 }
  0x60   : > { %1048 = vmatprep.mubr.msk.bf16.mxu0 %vm1357_vm0, %v1356_v0 }
 0x11f   : > { %v333_v6 = vpop.f32.mrf.mxu0 }
 0x120   : > { %v334_v7 = vadd.f32 %v990_v5, %v333_v6 }
 0x121   : > { %v1038_v8 = vpop.f32.mrf.mxu0 }
 0x122   : > { %v1549_v9 = vpack.c.bf16 %v334_v7, %v334_v7 }
 0x123   : > { %v336_v10 = vpop.f32.mrf.mxu0 }
 0x124   : > { %457 = vrot.lane.b32.xlu1 %v1549_v9, %s1358_s8  ;;  %346 = vrot.lane.b32.xlu0 %v1549_v9, %s1359_s10 }
 0x125   : > { %v1039_v11 = vpop.f32.mrf.mxu0 }
 0x128   : > { %570 = vrot.lane.b32.xlu1 %v1549_v9, %s1360_s11  ;;  %459 = vrot.lane.b32.xlu0 %v1549_v9, %s1361_s12  ;;  %s1007_s11 = sshll.u32 %s1424_s22, 7  ;;  %s268_s12 = scalar_lea.vmem [#allocation8], %s986_s14 }
 0x129   : > { %s876_s22 = scalar_lea.sflag [#allocation4], %s1521_s13  ;;  %s1372_s14 = smov [#allocation8]  }
 0x12c   : > { %681 = vrot.lane.b32.xlu1 %v1549_v9, %s1362_s30  ;;  %568 = vrot.lane.b32.xlu0 %v1549_v9, %s1363_s29  ;;  %s889_s30 = sshll.u32 %s268_s12, 4  ;;  %s1626_s30 = int_to_ptr.vmem [resolvable:$true] %s889_s30 }
 0x130   : > { %679 = vrot.lane.b32.xlu0 %v1549_v9, %s1364_s6 }
 0x196   : > { %v347_v12 = vpop.permute.xlu0 %346  ;;  %v458_v15 = vpop.permute.xlu1 %457 }
 0x197   : > { %v353_v13 = vsel %vm348_vm2, %v347_v12, 0 }
 0x198   : > { %1041 = vmatpush3.bf16.xpose.msra.mxu1 %v353_v13 }
 0x199   : > { %1052 = vmatprep.subr.bf16.mxu1 %v1356_v0 }
 0x19a   : > { %v460_v14 = vpop.permute.xlu0 %459  ;;  %v571_v17 = vpop.permute.xlu1 %570 }
 0x19b   : > { %v465_v16 = vsel %vm348_vm2, %v460_v14, 0  ;;  %v576_v18 = vsel %vm348_vm2, %v571_v17, 0 }
 0x19e   : > { %v682_v19 = vpop.permute.xlu1 %681  ;;  %v569_v20 = vpop.permute.xlu0 %568 }
 0x19f   : > { %1043 = vmatmul.mubr.msk.bf16.vlgmr.msra.gmra.mxu1 %vm348_vm2, %v1549_v9  ;;  %v687_v21 = vsel %vm348_vm2, %v682_v19, 0 }
 0x1a0   : > { %1053 = vmatpush3.bf16.xpose.msra.mxu1 %v465_v16  ;;  %1054 = vmatprep.mubr.msk.bf16.mxu1 %vm1357_vm0, %v1356_v0 }
 0x1a1   : > { %1064 = vmatprep.subr.bf16.mxu1 %v1356_v0 }
 0x1a2   : > { %v680_v22 = vpop.permute.xlu0 %679 }
 0x1a7   : > { %1055 = vmatmul.mubr.msk.bf16.vlgmr.msra.gmra.mxu1 %vm348_vm2, %v458_v15 }
 0x1a8   : > { %1065 = vmatpush3.bf16.xpose.msra.mxu1 %v576_v18  ;;  %1066 = vmatprep.mubr.msk.bf16.mxu1 %vm1357_vm0, %v1356_v0 }
 0x1a9   : > { %1076 = vmatprep.subr.bf16.mxu1 %v1356_v0 }
 0x1af   : > { %1067 = vmatmul.mubr.msk.bf16.vlgmr.msra.gmra.mxu1 %vm348_vm2, %v569_v20 }
 0x1b0   : > { %1077 = vmatpush3.bf16.xpose.msra.mxu1 %v687_v21  ;;  %1078 = vmatprep.mubr.msk.bf16.mxu1 %vm1357_vm0, %v1356_v0 }
 0x1b1   : > { %1088 = vmatprep.subr.bf16.mxu1 %v1356_v0 }
 0x1b7   : > { %1079 = vmatmul.mubr.msk.bf16.vlgmr.msra.gmra.mxu1 %vm348_vm2, %v680_v22 }
 0x1b8   : > { %1092 = vmatprep.mubr.msk.bf16.mxu1 %vm1357_vm0, %v1356_v0 }
 0x25f   : > { %v389_v26 = vpop.f32.mrf.mxu1 }
 0x260   : > { %v395_v27 = vsel %vm343_vm3, %v389_v26, -1e+30 }
 0x261   : > { %v1044_v28 = vpop.f32.mrf.mxu1  ;;  %v396_v29 = vsel %vm348_vm2, %v395_v27, -inf }
 0x262   : > { %397 = vmax.xlane.f32.xlu1 %v396_v29 }
 0x263   : > { %v392_v30 = vpop.f32.mrf.mxu1 }
 0x265   : > { %v1045_v31 = vpop.f32.mrf.mxu1 }
 0x267   : > { %v501_v32 = vpop.f32.mrf.mxu1 }
 0x268   : > { %v507_v33 = vsel %vm343_vm3, %v501_v32, -1e+30 }
 0x269   : > { %v1056_v34 = vpop.f32.mrf.mxu1  ;;  %v508_v35 = vsel %vm348_vm2, %v507_v33, -inf }
 0x26a   : > { %509 = vmax.xlane.f32.xlu0 %v508_v35 }
 0x26b   : > { %v504_v36 = vpop.f32.mrf.mxu1 }
 0x26d   : > { %v1057_v37 = vpop.f32.mrf.mxu1 }
 0x26f   : > { %v612_v38 = vpop.f32.mrf.mxu1 }
 0x270   : > { %v618_v39 = vsel %vm343_vm3, %v612_v38, -1e+30 }
 0x271   : > { %v1068_v40 = vpop.f32.mrf.mxu1  ;;  %v619_v41 = vsel %vm348_vm2, %v618_v39, -inf }
 0x272   : > { %620 = vmax.xlane.f32.xlu0 %v619_v41  ;;  %v1184_v40 = vld [vmem:[#allocation7] sm:$0xff]  }
 0x273   : > { %v615_v42 = vpop.f32.mrf.mxu1 }
 0x275   : > { %v1069_v43 = vpop.f32.mrf.mxu1 }
 0x277   : > { %v723_v44 = vpop.f32.mrf.mxu1 }
 0x278   : > { %v729_v45 = vsel %vm343_vm3, %v723_v44, -1e+30 }
 0x279   : > { %v1080_v46 = vpop.f32.mrf.mxu1  ;;  %v730_v47 = vsel %vm348_vm2, %v729_v45, -inf }
 0x27a   : > { %731 = vmax.xlane.f32.xlu1 %v730_v47 }
 0x27b   : > { %v726_v48 = vpop.f32.mrf.mxu1 }
 0x27d   : > { %v1081_v49 = vpop.f32.mrf.mxu1 }
 0x2eb   : > { %v398_v50 = vpop.xlane.xlu1 %397 }
 0x2ec   : > { %v399_v51 = vsub.f32 %v395_v27, %v398_v50 }
 0x2ee   : > { %v400_v52 = vmul.f32 1.442695, %v399_v51 }
 0x2f0   : > { %1185 = vpow2.f32 %v400_v52 }
 0x2f3   : > { %v510_v53 = vpop.xlane.xlu0 %509 }
 0x2f4   : > { %v511_v54 = vsub.f32 %v507_v33, %v510_v53 }
 0x2f6   : > { %v512_v55 = vmul.f32 1.442695, %v511_v54 }
 0x2f8   : > { %1187 = vpow2.f32 %v512_v55  ;;  %v1002_v55 = vld [vmem:[%s1672_s4] ss:$0 sm:$0xff] }
 0x2fb   : > { %v621_v56 = vpop.xlane.xlu0 %620 }
 0x2fc   : > { %v622_v57 = vsub.f32 %v618_v39, %v621_v56  ;;  %v1183_v39 = vld [vmem:[#allocation7 + $0x8] sm:$0xff]  }
 0x2fd   : > { %v1186_v58 = vpop.eup %1185  ;;  %1089 = vmatpush3.bf16.msra.mxu1 %v1183_v39 }
 0x2fe   : > { %v623_v59 = vmul.f32 1.442695, %v622_v57  ;;  %v402_v60 = vsel %vm348_vm2, %v1186_v58, 0.0  ;;  %1090 = vmatprep.subr.bf16.mxu1 %v1356_v0 }
 0x2ff   : > { %403 = vadd.xlane.f32.xlu0 %v402_v60 }
 0x300   : > { %1189 = vpow2.f32 %v623_v59 }
 0x301   : > { %1091 = vmatpush3.bf16.msra.mxu1 %v1184_v40 }
 0x303   : > { %v732_v2 = vpop.xlane.xlu1 %731 }
 0x304   : > { %v733_v3 = vsub.f32 %v729_v45, %v732_v2 }
 0x305   : > { %v1188_v61 = vpop.eup %1187 }
 0x306   : > { %v514_v62 = vsel %vm348_vm2, %v1188_v61, 0.0  ;;  %v734_v4 = vmul.f32 1.442695, %v733_v3 }
 0x307   : > { %515 = vadd.xlane.f32.xlu1 %v514_v62 }
 0x308   : > { %1191 = vpow2.f32 %v734_v4 }
 0x30d   : > { %v1190_v63 = vpop.eup %1189 }
 0x30e   : > { %v625_v1 = vsel %vm348_vm2, %v1190_v63, 0.0 }
 0x30f   : > { %626 = vadd.xlane.f32.xlu0 %v625_v1 }
 0x315   : > { %v1192_v5 = vpop.eup %1191 }
 0x316   : > { %v736_v6 = vsel %vm348_vm2, %v1192_v5, 0.0 }
 0x318   : > { %520 = vrot.lane.b32.xlu1 %v1549_v9, %s1365_s28  ;;  %s1624_s28 = scalar_lea.hbm %s1673_s5, %s1007_s11 }
 0x325   : > { %408 = vrot.lane.b32.xlu0 %v1549_v9, %s1366_s7  ;;  %s1281_s7 = scalar_lea.vmem %s1626_s30, 128 }
 0x326   : > { %p1282_p11 = scmp.ne.s32.totalorder %s1626_s30, %s1281_s7 }
 0x328   : > { %p1283_p1 = pnand %p1282_p11, %p1689_p0 }
 0x329   : > { %742 = vrot.lane.b32.xlu0 %v1549_v9, %s1367_s9  ;;  %s1285_s9 = sshll.u32 %s1372_s14, 4  ;;  %s1286_s9 = int_to_ptr.vmem [resolvable:$false] %s1285_s9 }
 0x32a   : > { %p1284_p2 = pneg %p1283_p1  ;;  %p1288_p6 = scmp.lt.s32.totalorder %s1626_s30, %s1286_s9 }
 0x33c   : > { %737 = vadd.xlane.f32.xlu1 %v736_v6 }
 0x34d   : > { %631 = vrot.lane.b32.xlu1 %v1549_v9, %s1368_s16  ;;  %s1287_s16 = scalar_lea.vmem %s1286_s9, 256 }
 0x34e   : > { %p1289_p12 = scmp.lt.s32.totalorder %s1287_s16, %s1281_s7 }
 0x350   : > { %p1290_p7 = por %p1289_p12, %p1288_p6 }
 0x352   : > { %p1291_p9 = pnand %p1290_p7, %p1284_p2 }
 0x388   : > { %v404_v7 = vpop.xlane.xlu0 %403 }
 0x389   : > { %1193 = vrcp.f32 %v404_v7 }
 0x390   : > { %v516_v8 = vpop.xlane.xlu1 %515 }
 0x391   : > { %1195 = vrcp.f32 %v516_v8 }
 0x394   : > { %v521_v15 = vpop.permute.xlu1 %520 }
 0x395   : > { %v526_v18 = vsel %vm413_vm4, %v521_v15, 0 }
 0x396   : > { %v1194_v10 = vpop.eup %1193 }
 0x397   : > { %v406_v12 = vmul.f32 %v1194_v10, %v1186_v58 }
 0x398   : > { %v627_v11 = vpop.xlane.xlu0 %626 }
 0x399   : > { %v407_v16 = vpack.c.bf16 %v406_v12, %v406_v12  ;;  %1197 = vrcp.f32 %v627_v11 }
 0x39c   : > { %v409_v13 = vpop.permute.xlu0 %408 }
 0x39d   : > { %v415_v14 = vsel %vm413_vm4, %v409_v13, 0 }
 0x39e   : > { %1047 = vmatpush3.bf16.msra.mxu0 %v415_v14  ;;  %v1196_v17 = vpop.eup %1195 }
 0x39f   : > { %1058 = vmatprep.subr.bf16.mxu0 %v1356_v0  ;;  %v518_v9 = vmul.f32 %v1196_v17, %v1188_v61 }
 0x3a0   : > { %v743_v25 = vpop.permute.xlu0 %742 }
 0x3a1   : > { %1049 = vmatmul.mubr.msk.bf16.vlgmr.msra.gmra.mxu0 %vm348_vm2, %v407_v16  ;;  %v519_v19 = vpack.c.bf16 %v518_v9, %v518_v9  ;;  %v748_v27 = vsel %vm413_vm4, %v743_v25, 0 }
 0x3a2   : > { %1059 = vmatpush3.bf16.msra.mxu0 %v526_v18  ;;  %1060 = vmatprep.mubr.msk.bf16.mxu0 %vm1357_vm0, %v1356_v0 }
 0x3a3   : > { %1070 = vmatprep.subr.bf16.mxu0 %v1356_v0 }
 0x3a6   : > { %v1198_v20 = vpop.eup %1197 }
 0x3a7   : > { %v629_v22 = vmul.f32 %v1198_v20, %v1190_v63 }
 0x3a9   : > { %1061 = vmatmul.mubr.msk.bf16.vlgmr.msra.gmra.mxu0 %vm348_vm2, %v519_v19  ;;  %v630_v26 = vpack.c.bf16 %v629_v22, %v629_v22 }
 0x3aa   : > { %1072 = vmatprep.mubr.msk.bf16.mxu0 %vm1357_vm0, %v1356_v0 }
 0x3c5   : > { %v738_v21 = vpop.xlane.xlu1 %737 }
 0x3c6   : > { %1199 = vrcp.f32 %v738_v21 }
 0x3c9   : > { %v632_v23 = vpop.permute.xlu1 %631 }
 0x3ca   : > { %v637_v24 = vsel %vm413_vm4, %v632_v23, 0 }
 0x3cb   : > { %1071 = vmatpush3.bf16.msra.mxu0 %v637_v24 }
 0x3cc   : > { %1082 = vmatprep.subr.bf16.mxu0 %v1356_v0 }
 0x3ce   : > { %1073 = vmatmul.mubr.msk.bf16.vlgmr.msra.gmra.mxu0 %vm348_vm2, %v630_v26 }
 0x3cf   : > { %1083 = vmatpush3.bf16.msra.mxu0 %v748_v27  ;;  %1084 = vmatprep.mubr.msk.bf16.mxu0 %vm1357_vm0, %v1356_v0 }
 0x3d3   : > { %v1200_v28 = vpop.eup %1199 }
 0x3d4   : > { %v740_v29 = vmul.f32 %v1200_v28, %v1192_v5 }
 0x3d6   : > { %v741_v30 = vpack.c.bf16 %v740_v29, %v740_v29 }
 0x3d8   : > { %1085 = vmatmul.mubr.msk.bf16.vlgmr.msra.gmra.mxu0 %vm348_vm2, %v741_v30 }
 0x461   : > { %v451_v31 = vpop.f32.mrf.mxu0 }
 0x463   : > { %v1050_v32 = vpop.f32.mrf.mxu0 }
 0x465   : > { %v454_v33 = vpop.f32.mrf.mxu0 }
 0x467   : > { %v1051_v34 = vpop.f32.mrf.mxu0 }
 0x469   : > { %v562_v35 = vpop.f32.mrf.mxu0 }
 0x46a   : > { %791 = vrot.lane.b32.xlu1 %v562_v35, %s1369_s17 }
 0x46b   : > { %v1062_v36 = vpop.f32.mrf.mxu0 }
 0x46d   : > { %v565_v37 = vpop.f32.mrf.mxu0 }
 0x46f   : > { %v1063_v38 = vpop.f32.mrf.mxu0 }
 0x48e   : > { %v673_v41 = vpop.f32.mrf.mxu0 }
 0x48f   : > { %795 = vrot.lane.b32.xlu0 %v673_v41, %s1370_s24 }
 0x490   : > { %v1074_v42 = vpop.f32.mrf.mxu0 }
 0x492   : > { %v676_v43 = vpop.f32.mrf.mxu0 }
 0x494   : > { %v1075_v44 = vpop.f32.mrf.mxu0 }
 0x498   : > { %v784_v45 = vpop.f32.mrf.mxu0 }
 0x499   : > { %799 = vrot.lane.b32.xlu1 %v784_v45, %s1371_s26 }
 0x49a   : > { %v1086_v46 = vpop.f32.mrf.mxu0 }
 0x49c   : > { %v787_v47 = vpop.f32.mrf.mxu0 }
 0x49e   : > { %v1087_v48 = vpop.f32.mrf.mxu0 }
 0x4dc   : > { %v792_v49 = vpop.permute.xlu1 %791 }
 0x4dd   : > { %v802_v0 = vsel %vm348_vm2, %v451_v31, %v792_v49 }
 0x501   : > { %v796_v50 = vpop.permute.xlu0 %795 }
 0x502   : > { %v804_v51 = vsel %vm803_vm5, %v802_v0, %v796_v50 }
 0x50b   : > { %v800_v52 = vpop.permute.xlu1 %799 }
 0x50c   : > { %v806_v53 = vsel %vm805_vm6, %v804_v51, %v800_v52 }
 0x50d   : > { %v807_v54 = vpack.c.bf16 %v806_v53, %v806_v53 }
 0x50f   : > { %1093 = vmatmul.mubr.msk.bf16.vlgmr.msra.gmra.mxu1 %vm295_vm1, %v807_v54 }
 0x5cf   : > { %v868_v56 = vpop.f32.mrf.mxu1 }
 0x5d0   : > { %v869_v57 = vadd.f32 %v1002_v55, %v868_v56 }
 0x5d1   : > { %v1094_v58 = vpop.f32.mrf.mxu1 }
 0x5d2   : > { %874 = vst.msk [vmem:[%s268_s12] sm:$0xff] %vm295_vm1, %v869_v57 }
 0x5d3   : > { %v871_v59 = vpop.f32.mrf.mxu1 }
 0x5d4   : > { %1294 = shalt.err (!%p1291_p9)
}
 0x5d5   : > { %s1295_s17 = scalar_lea.hbm %s1624_s28, 128  ;;  %s1299_s26 = scalar_lea.hbm %s1673_s5, 256 }
 0x5d6   : > { %p1296_p13 = scmp.ne.s32.totalorder %s1624_s28, %s1295_s17  ;;  %p1300_p4 = scmp.lt.s32.totalorder %s1624_s28, %s1673_s5 }
 0x5d7   : > { %p1301_p8 = scmp.lt.s32.totalorder %s1299_s26, %s1295_s17 }
 0x5d8   : > { %p1297_p5 = pnand %p1296_p13, %p1689_p0 }
 0x5d9   : > { %p1302_p3 = por %p1301_p8, %p1300_p4 }
 0x5da   : > { %p1298_p10 = pneg %p1297_p5 }
 0x5dc   : > { %p1303_p11 = pnand %p1302_p3, %p1298_p10 }
 0x5de   : > { %1306 = shalt.err (!%p1303_p11)
}
 0x5df   : > { %1106 = dma.vmem_to_hbm [thread:$0]  (%p1689_p0), %s1626_s30, 128, %s1624_s28, %s876_s22   ;;  %v1095_v60 = vpop.f32.mrf.mxu1 }
 0x5e0 PF: > { %s901_s11 = sand.u32 1, %s1337_s18   ;;  %p1690_p1 = scmp.ne.s32.totalorder %s1679_s25, 0 }
 0x5e1   : > { %p1691_p2 = scmp.ge.s32.totalorder %s1349_s21, 2  ;;  %s902_s12 = scalar_lea.sflag [#allocation4], %s901_s11 }
 0x5e3   : > { %p1120_p6 = pnand %p1691_p2, %p1690_p1 }
 0x5e5   : > { %p1121_p12 = pneg %p1120_p6 }
 0x5e7   : > { %1332 = dma.done.wait (%p1121_p12), %s902_s12, 128  }
 0x5e8   : > { %1334 = vsyncadd (%p1121_p12), %s902_s12, 4294967168  ;;  %p19_p7 = scmp.ge.s32.totalorder %s1475_s15, 4   ;;  %s1692_s18 = smov %s1341_s19 }
 0x5e9   : > { %s1693_s19 = smov %s1345_s20  ;;  %s1694_s20 = smov %s1491_s27 }
 0x5ea   : > { %s1695_s21 = smov %s1475_s15  ;;  %21 = sbr.rel (!%p19_p7) target bundleno = 6 (0x6), region = 93 }
 0x5ef   :  { %907 = vsyncpa [#allocation3], 1 }
 0x5f0   :  { %909 = vsyncpa [#allocation3 + $0x1], 1 }
 0x5f1   :  { %910 = vsyncpa [#allocation6], 1 }
 0x5f2   :  { %911 = vsyncpa [#allocation4], 1 }
 0x5f3   :  { %913 = vsyncpa [#allocation4 + $0x1], 1 }

</bundles_post_ra>
